<compile_context>
chip_gen: v5e
topology: v5e:2x2
jax: 0.10.0
libtpu: 0.0.40
codegen_flags: <defaults>
</compile_context>

<pallas_src>
import jax
import jax.numpy as jnp
from jax.experimental import pallas as pl
from jax.experimental.pallas import tpu as pltpu


def _round_up(n, m):
    return ((n + m - 1) // m) * m


def _linear_kernel(x_ref, w_ref, b_ref, o_ref):
    # x_ref: [TB, F] bf16   w_ref: [F, Cp] bf16   b_ref: [1, Cp] f32   o_ref: [TB, Cp] f32
    acc = jnp.dot(x_ref[...], w_ref[...], preferred_element_type=jnp.float32)
    o_ref[...] = (acc + b_ref[...]).astype(o_ref.dtype)


def linear_forward(x, w, b=None, *, compute_dtype=jnp.bfloat16, tb_max=512):
    """LinearLayer forward: y = x @ w + b.

    x: [B, F] activations, w: [F, C] weight (transposed nn.Linear weight),
    b: [C] bias or None (use_bias=False).
    Returns [B, C] float32.
    """
    B, F = x.shape
    C = w.shape[1]
    if b is None:
        b = jnp.zeros((C,), jnp.float32)

    # --- padding for lane-dense stores / full-width MXU / whole sublane groups ---
    Cp = _round_up(C, 128)                    # lane axis multiple of 128
    TB = min(tb_max, _round_up(B, 8))         # batch tile, multiple of 8, VMEM-safe on v7x
    Bp = _round_up(B, TB)

    x_p = jnp.zeros((Bp, F), compute_dtype).at[:B, :].set(x.astype(compute_dtype))
    w_p = jnp.zeros((F, Cp), compute_dtype).at[:, :C].set(w.astype(compute_dtype))
    b_p = jnp.zeros((1, Cp), jnp.float32).at[0, :C].set(b.astype(jnp.float32))

    grid = (Bp // TB,)

    out_p = pl.pallas_call(
        _linear_kernel,
        out_shape=jax.ShapeDtypeStruct((Bp, Cp), jnp.float32),
        grid=grid,
        in_specs=[
            pl.BlockSpec((TB, F), lambda i: (i, 0)),   # activations: tiled over batch
            pl.BlockSpec((F, Cp), lambda i: (0, 0)),   # weight: resident across grid
            pl.BlockSpec((1, Cp), lambda i: (0, 0)),   # bias: resident across grid
        ],
        out_specs=pl.BlockSpec((TB, Cp), lambda i: (i, 0)),
        compiler_params=pltpu.CompilerParams(
            dimension_semantics=("parallel",),          # shard batch across TCs on v7x
        ),
    )(x_p, w_p, b_p)

    return out_p[:B, :C]


if __name__ == "__main__":
    key = jax.random.PRNGKey(0)
    k_x, k_w, k_b = jax.random.split(key, 3)

    # Small shapes consistent with LinearLayer(in_features, out_features)
    B, F, C = 4, 512, 10

    x = jax.random.normal(k_x, (B, F), dtype=jnp.float32)

    # nn.Linear-style init: U(-1/sqrt(fan_in), 1/sqrt(fan_in))
    bound = 1.0 / (F ** 0.5)
    w = jax.random.uniform(k_w, (F, C), dtype=jnp.float32, minval=-bound, maxval=bound)
    b = jax.random.uniform(k_b, (C,), dtype=jnp.float32, minval=-bound, maxval=bound)

    out = linear_forward(x, w, b)
    out = jax.block_until_ready(out)

    # Reference in plain JAX with the same bf16-in / f32-accumulate math.
    ref = jnp.dot(x.astype(jnp.bfloat16), w.astype(jnp.bfloat16),
                  preferred_element_type=jnp.float32) + b

    assert out.shape == (B, C)
    assert jnp.allclose(out, ref, atol=2e-3, rtol=2e-3)

    print("KERNEL_OK")
</pallas_src>

<mosaic_0001>
module attributes {stable_mosaic.version = 11 : i64} {
  func.func @_linear_kernel(%arg0: i32, %arg1: memref<8x512xbf16, #tpu.memory_space<vmem>>, %arg2: memref<512x128xbf16, #tpu.memory_space<vmem>>, %arg3: memref<1x128xf32, #tpu.memory_space<vmem>>, %arg4: memref<8x128xf32, #tpu.memory_space<vmem>>) attributes {dimension_semantics = [#tpu.dimension_semantics<parallel>], iteration_bounds = array<i64: 1>, scalar_prefetch = 0 : i64, scratch_operands = 0 : i64, tpu.core_type = #tpu.core_type<tc>, window_params = [{transform_indices = @transform_0, window_bounds = array<i64: 8, 512>}, {pipeline_mode = #tpu.pipeline_mode<synchronous>, transform_indices = @transform_1, window_bounds = array<i64: 512, 128>}, {pipeline_mode = #tpu.pipeline_mode<synchronous>, transform_indices = @transform_2, window_bounds = array<i64: 1, 128>}, {transform_indices = @transform_3, window_bounds = array<i64: 8, 128>}]} {
    %c0 = arith.constant 0 : index
    %c0_0 = arith.constant 0 : index
    %0 = vector.load %arg1[%c0, %c0_0] : memref<8x512xbf16, #tpu.memory_space<vmem>>, vector<8x512xbf16>
    %c0_1 = arith.constant 0 : index
    %c0_2 = arith.constant 0 : index
    %1 = vector.load %arg2[%c0_1, %c0_2] : memref<512x128xbf16, #tpu.memory_space<vmem>>, vector<512x128xbf16>
    %cst = arith.constant dense<0.000000e+00> : vector<8x128xf32>
    %2 = tpu.matmul %0, %1, %cst {dimension_numbers = #tpu.dot_dimension_numbers<[1], [0], [0], [1], [0, 0, 1, 1], [], []>} : vector<8x512xbf16>, vector<512x128xbf16>, vector<8x128xf32> -> vector<8x128xf32>
    %c0_3 = arith.constant 0 : index
    %c0_4 = arith.constant 0 : index
    %3 = vector.load %arg3[%c0_3, %c0_4] : memref<1x128xf32, #tpu.memory_space<vmem>>, vector<1x128xf32>
    %4 = vector.broadcast %3 : vector<1x128xf32> to vector<8x128xf32>
    %5 = arith.addf %2, %4 : vector<8x128xf32>
    %c0_5 = arith.constant 0 : index
    %c0_6 = arith.constant 0 : index
    %6 = vector.load %arg4[%c0_5, %c0_6] : memref<8x128xf32, #tpu.memory_space<vmem>>, vector<8x128xf32>
    tpu.vector_store %arg4[%c0_5, %c0_6], %5 {strides = array<i32>} : memref<8x128xf32, #tpu.memory_space<vmem>>, vector<8x128xf32>,
    return
  }
  func.func @transform_0(%arg0: i32) -> (i32, i32) {
    %c0_i32 = arith.constant 0 : i32
    %c0_i32_0 = arith.constant 0 : i32
    return %arg0, %c0_i32 : i32, i32
  }
  func.func @transform_1(%arg0: i32) -> (i32, i32) {
    %c0_i32 = arith.constant 0 : i32
    %c0_i32_0 = arith.constant 0 : i32
    %c0_i32_1 = arith.constant 0 : i32
    return %c0_i32, %c0_i32_0 : i32, i32
  }
  func.func @transform_2(%arg0: i32) -> (i32, i32) {
    %c0_i32 = arith.constant 0 : i32
    %c0_i32_0 = arith.constant 0 : i32
    %c0_i32_1 = arith.constant 0 : i32
    return %c0_i32, %c0_i32_0 : i32, i32
  }
  func.func @transform_3(%arg0: i32) -> (i32, i32) {
    %c0_i32 = arith.constant 0 : i32
    %c0_i32_0 = arith.constant 0 : i32
    return %arg0, %c0_i32 : i32, i32
  }
}

</mosaic_0001>

<bundles_post_ra>
// kernel: tpu_custom_call.1
= control target key start
LH: loop header
LB: loop body
LE: loop exit
PB: predicated region body
PF: predicated region fallthrough
CT: control target
= control target key end

     0   :  { %8 = vsyncpa [#allocation3], 0  ;;  %s673_s0 = inlined_call_operand.hbm [shape: bf16[8,512], index: 0, kind: input, shape index: {}]   ;;  %s674_s1 = inlined_call_operand.hbm [shape: bf16[512,128], index: 1, kind: input, shape index: {}]   ;;  %s675_s2 = inlined_call_operand.vmem [shape: f32[1,128], index: 2, kind: input, shape index: {}]   ;;  %s676_s3 = inlined_call_operand.hbm [shape: f32[8,128], index: 3, kind: output, shape index: {}]  }
   0x1   :  { %9 = vsyncpa [#allocation6], 0 }
   0x2   :  { %10 = vsyncpa [#allocation4], 0  ;;  %s16_s14 = sshll.u32 %s673_s0, 4  ;;  %s636_s15 = smov [#allocation2]   ;;  %s17_s14 = int_to_ptr.hbm [resolvable:$true] %s16_s14 }
   0x3   :  { %s18_s16 = sshll.u32 %s636_s15, 4  ;;  %s26_s19 = sshll.u32 %s674_s1, 4  ;;  %s19_s16 = int_to_ptr.vmem [resolvable:$true] %s18_s16  ;;  %s27_s19 = int_to_ptr.hbm [resolvable:$true] %s26_s19 }
   0x4   :  { %21 = dma.hbm_to_vmem [thread:$0]  %s17_s14, 256, %s19_s16, [#allocation3]  }
   0x5   :  { %s637_s20 = smov [#allocation5]   ;;  %s638_s22 = smov 64  }
   0x6   :  { %s28_s21 = sshll.u32 %s637_s20, 4  ;;  %s639_s23 = smov 4   ;;  %s29_s21 = int_to_ptr.vmem [resolvable:$true] %s28_s21 }
   0x7   :  { %34 = dma.hbm_to_vmem [thread:$0]  %s27_s19, 4096, %s29_s21, [#allocation6], %s638_s22, %s638_s22, %s639_s23  }
   0x8   :  { %630 = dma.done.wait [#allocation3], 256  }
   0x9   :  { %631 = vsyncadd [#allocation3], 4294967040 }
   0xa   :  { %632 = dma.done.wait [#allocation6], 4096  }
   0xb   :  { %633 = vsyncadd [#allocation6], 4294963200  ;;  %v527_v0 = vld [vmem:[#allocation5 + $0x38] sm:$0xff]  ;;  %v526_v4 = vld [vmem:[#allocation5 + $0x30] sm:$0xff]  ;;  %s640_s24 = smov [#allocation7]   ;;  %s381_s28 = sshll.u32 %s676_s3, 4  ;;  %s382_s28 = int_to_ptr.hbm [resolvable:$true] %s381_s28 }
   0xc   :  { %v535_v1 = vld [vmem:[#allocation5 + $0x78] sm:$0xff]  ;;  %321 = vmatpush.bf16.msra.mxu0 %v527_v0  ;;  %v534_v5 = vld [vmem:[#allocation5 + $0x70] sm:$0xff]  ;;  %v525_v8 = vld [vmem:[#allocation5 + $0x28] sm:$0xff]  ;;  %s379_s25 = sshll.u32 %s640_s24, 4  ;;  %s380_s25 = int_to_ptr.vmem [resolvable:$true] %s379_s25 }
   0xd   :  { %v543_v2 = vld [vmem:[#allocation5 + $0xb8] sm:$0xff]  ;;  %334 = vmatpush.bf16.msra.mxu1 %v535_v1  ;;  %v542_v6 = vld [vmem:[#allocation5 + $0xb0] sm:$0xff]  ;;  %v533_v9 = vld [vmem:[#allocation5 + $0x68] sm:$0xff] }
   0xe   :  { %v551_v3 = vld [vmem:[#allocation5 + $0xf8] sm:$0xff]  ;;  %347 = vmatpush.bf16.msra.mxu2 %v543_v2  ;;  %v550_v7 = vld [vmem:[#allocation5 + $0xf0] sm:$0xff]  ;;  %v541_v10 = vld [vmem:[#allocation5 + $0xa8] sm:$0xff] }
   0xf   :  { %360 = vmatpush.bf16.msra.mxu3 %v551_v3  ;;  %v549_v11 = vld [vmem:[#allocation5 + $0xe8] sm:$0xff]  ;;  %v524_v12 = vld [vmem:[#allocation5 + $0x20] sm:$0xff]  ;;  %v523_v16 = vld [vmem:[#allocation5 + $0x18] sm:$0xff] }
  0x10   :  { %322 = vmatpush.bf16.msra.mxu0 %v526_v4  ;;  %v532_v13 = vld [vmem:[#allocation5 + $0x60] sm:$0xff]  ;;  %v531_v17 = vld [vmem:[#allocation5 + $0x58] sm:$0xff]  ;;  %v522_v20 = vld [vmem:[#allocation5 + $0x10] sm:$0xff] }
  0x11   :  { %335 = vmatpush.bf16.msra.mxu1 %v534_v5  ;;  %v540_v14 = vld [vmem:[#allocation5 + $0xa0] sm:$0xff]  ;;  %v539_v18 = vld [vmem:[#allocation5 + $0x98] sm:$0xff]  ;;  %v530_v21 = vld [vmem:[#allocation5 + $0x50] sm:$0xff] }
  0x12   :  { %348 = vmatpush.bf16.msra.mxu2 %v542_v6  ;;  %v548_v15 = vld [vmem:[#allocation5 + $0xe0] sm:$0xff]  ;;  %v547_v19 = vld [vmem:[#allocation5 + $0xd8] sm:$0xff]  ;;  %v538_v22 = vld [vmem:[#allocation5 + $0x90] sm:$0xff] }
  0x13   :  { %361 = vmatpush.bf16.msra.mxu3 %v550_v7  ;;  %v546_v23 = vld [vmem:[#allocation5 + $0xd0] sm:$0xff]  ;;  %v521_v24 = vld [vmem:[#allocation5 + $0x8] sm:$0xff]  ;;  %v46_v29 = vld [vmem:[#allocation2 + $0x8] sm:$0xff] }
  0x14   :  { %323 = vmatpush.bf16.msra.mxu0 %v525_v8  ;;  %v529_v25 = vld [vmem:[#allocation5 + $0x48] sm:$0xff]  ;;  %v45_v26 = vld [vmem:[#allocation2] sm:$0xff]  ;;  %v520_v32 = vld [vmem:[#allocation5] sm:$0xff]  ;;  %v119_v34 = vunpack.c.l.b16 %v46_v29  ;;  %v120_v35 = vunpack.c.h.b16 %v46_v29 }
  0x15   :  { %336 = vmatpush.bf16.msra.mxu1 %v533_v9  ;;  %v537_v27 = vld [vmem:[#allocation5 + $0x88] sm:$0xff]  ;;  %v117_v30 = vunpack.c.l.b16 %v45_v26  ;;  %v118_v31 = vunpack.c.h.b16 %v45_v26  ;;  %v528_v33 = vld [vmem:[#allocation5 + $0x40] sm:$0xff]  ;;  %v557_v42 = vld [vmem:[%s675_s2] ss:$0 sm:$0xff] }
  0x16   :  { %349 = vmatpush.bf16.msra.mxu2 %v541_v10  ;;  %v545_v28 = vld [vmem:[#allocation5 + $0xc8] sm:$0xff]  ;;  %v536_v36 = vld [vmem:[#allocation5 + $0x80] sm:$0xff]  ;;  %v123_v40 = vpack.c.b16 %v119_v34, %v119_v34  ;;  %v124_v41 = vpack.c.b16 %v120_v35, %v120_v35 }
  0x17   :  { %362 = vmatpush.bf16.msra.mxu3 %v549_v11  ;;  %v544_v37 = vld [vmem:[#allocation5 + $0xc0] sm:$0xff]  ;;  %v121_v38 = vpack.c.b16 %v117_v30, %v117_v30  ;;  %v122_v39 = vpack.c.b16 %v118_v31, %v118_v31 }
  0x18   :  { %324 = vmatpush.bf16.msra.mxu0 %v524_v12 }
  0x19   :  { %337 = vmatpush.bf16.msra.mxu1 %v532_v13 }
  0x1a   :  { %350 = vmatpush.bf16.msra.mxu2 %v540_v14 }
  0x1b   :  { %363 = vmatpush.bf16.msra.mxu3 %v548_v15 }
  0x1c   :  { %325 = vmatpush.bf16.msra.mxu0 %v523_v16 }
  0x1d   :  { %338 = vmatpush.bf16.msra.mxu1 %v531_v17 }
  0x1e   :  { %351 = vmatpush.bf16.msra.mxu2 %v539_v18 }
  0x1f   :  { %364 = vmatpush.bf16.msra.mxu3 %v547_v19 }
  0x20   :  { %326 = vmatpush.bf16.msra.mxu0 %v522_v20 }
  0x21   :  { %339 = vmatpush.bf16.msra.mxu1 %v530_v21 }
  0x22   :  { %352 = vmatpush.bf16.msra.mxu2 %v538_v22 }
  0x23   :  { %365 = vmatpush.bf16.msra.mxu3 %v546_v23 }
  0x24   :  { %327 = vmatpush.bf16.msra.mxu0 %v521_v24 }
  0x25   :  { %340 = vmatpush.bf16.msra.mxu1 %v529_v25 }
  0x26   :  { %353 = vmatpush.bf16.msra.mxu2 %v537_v27 }
  0x27   :  { %366 = vmatpush.bf16.msra.mxu3 %v545_v28 }
  0x28   :  { %328 = vmatpush.bf16.msra.mxu0 %v520_v32 }
  0x29   :  { %341 = vmatpush.bf16.msra.mxu1 %v528_v33 }
  0x2a   :  { %354 = vmatpush.bf16.msra.mxu2 %v536_v36 }
  0x2b   :  { %367 = vmatpush.bf16.msra.mxu3 %v544_v37  ;;  %329 = vmatmul.bf16.vlgmr.msra.gmra.mxu0 %v121_v38 }
  0x2c   :  { %342 = vmatmul.bf16.vlgmr.msra.gmra.mxu1 %v122_v39 }
  0x2d   :  { %355 = vmatmul.bf16.vlgmr.msra.gmra.mxu2 %v123_v40 }
  0x2e   :  { %368 = vmatmul.bf16.vlgmr.msra.gmra.mxu3 %v124_v41 }
  0xa8   :  { %v330_v43 = vpop.f32.mrf.mxu0 }
  0xa9   :  { %v343_v44 = vpop.f32.mrf.mxu1  ;;  %v331_v45 = vadd.f32 %v557_v42, %v330_v43 }
  0xab   :  { %v344_v46 = vadd.f32 %v343_v44, %v331_v45 }
  0xb0   :  { %v356_v47 = vpop.f32.mrf.mxu2  ;;  %v332_v50 = vpop.f32.mrf.mxu0 }
  0xb1   :  { %v369_v48 = vpop.f32.mrf.mxu3  ;;  %v357_v49 = vadd.f32 %v356_v47, %v344_v46  ;;  %v345_v51 = vpop.f32.mrf.mxu1 }
  0xb3   :  { %v370_v52 = vadd.f32 %v369_v48, %v357_v49 }
  0xb5   :  { %373 = vst [vmem:[#allocation7] sm:$0xff] %v370_v52 }
  0xb6   :  { %384 = dma.vmem_to_hbm [thread:$0]  %s380_s25, 128, %s382_s28, [#allocation4]  }
  0xb8   :  { %v358_v53 = vpop.f32.mrf.mxu2 }
  0xb9   :  { %v371_v54 = vpop.f32.mrf.mxu3 }
  0xba   :  { %634 = dma.done.wait [#allocation4], 128  }
  0xbb   :  { %635 = vsyncadd [#allocation4], 4294967168 }
  0xbc   :  { %389 = vsyncpa [#allocation3], 1 }
  0xbd   :  { %390 = vsyncpa [#allocation6], 1 }
  0xbe   :  { %391 = vsyncpa [#allocation4], 1 }

</bundles_post_ra>
